<compile_context>
chip_gen: v7x
topology: tpu7x:2x2x1
jax: 0.10.0
libtpu: 0.0.40
codegen_flags: <defaults>
</compile_context>

<pallas_src>
import functools

import jax
import jax.numpy as jnp
from jax import lax
from jax.experimental import pallas as pl
from jax.experimental.pallas import tpu as pltpu

_LANE = 128      # gate / output dims padded to a multiple of this
_SUBLANE = 8     # batch padded to a multiple of this
_TC = 8          # timesteps per grid step in the fused sequence kernel


def _round_up(n, m):
    return ((n + m - 1) // m) * m


def _join(xs):
    """Join a list of read tensors; no-op for a single tensor (the common case)."""
    if isinstance(xs, (list, tuple)):
        return xs[0] if len(xs) == 1 else jnp.concatenate(list(xs), axis=-1)
    return xs


def _pad_rows(x, n_rows):
    return x if x.shape[0] == n_rows else jnp.pad(x, ((0, n_rows - x.shape[0]), (0, 0)))


def _pad_gate_cols(w_t, H, Hp):
    """(K, 4H) with columns ordered [i|f|g|o] -> (K, 4*Hp); each gate block zero-padded."""
    K = w_t.shape[0]
    w = w_t.reshape(K, 4, H)
    w = jnp.pad(w, ((0, 0), (0, 0), (0, Hp - H)))
    return w.reshape(K, 4 * Hp)


# ---------------------------------------------------------------------------
# Kernels
# ---------------------------------------------------------------------------
def _lstm_update(gates, c, Hp):
    """gates: (B, 4*Hp) lane-aligned; c: (B, Hp). Returns (h_new, c_new)."""
    i_g = jax.nn.sigmoid(gates[:, 0 * Hp:1 * Hp])
    f_g = jax.nn.sigmoid(gates[:, 1 * Hp:2 * Hp])
    g_g = jnp.tanh(gates[:, 2 * Hp:3 * Hp])
    o_g = jax.nn.sigmoid(gates[:, 3 * Hp:4 * Hp])
    c_new = f_g * c + i_g * g_g
    h_new = o_g * jnp.tanh(c_new)
    return h_new, c_new


def _cell_kernel(x_ref, r_ref, h_ref, c_ref, w_in_ref, w_rd_ref, w_hh_ref, b_ref,
                 h_out_ref, c_out_ref):
    """Single LSTMCell step; inputs arrive un-concatenated (weights row-split)."""
    gates = (jnp.dot(x_ref[...], w_in_ref[...], preferred_element_type=jnp.float32)
             + jnp.dot(r_ref[...], w_rd_ref[...], preferred_element_type=jnp.float32)
             + jnp.dot(h_ref[...], w_hh_ref[...], preferred_element_type=jnp.float32)
             + b_ref[...])
    Hp = h_ref.shape[1]
    h_new, c_new = _lstm_update(gates, c_ref[...], Hp)
    h_out_ref[...] = h_new.astype(h_out_ref.dtype)
    c_out_ref[...] = c_new.astype(c_out_ref.dtype)


def _head_kernel(h_ref, r_ref, wo_h_ref, wo_r_ref, bo_ref, o_ref):
    """output head: sigmoid([h, reads] @ W^T + b), with W row-split (no concat)."""
    y = (jnp.dot(h_ref[...], wo_h_ref[...], preferred_element_type=jnp.float32)
         + jnp.dot(r_ref[...], wo_r_ref[...], preferred_element_type=jnp.float32)
         + bo_ref[...])
    o_ref[...] = jax.nn.sigmoid(y).astype(o_ref.dtype)


def _fused_step_kernel(x_ref, pr_ref, rd_ref, h_ref, c_ref,
                       w_in_ref, w_rd_ref, w_hh_ref, b_ref,
                       woh_ref, wor_ref, bo_ref,
                       h_out_ref, c_out_ref, o_out_ref):
    """forward() + output() fused into a single launch (T=1 hot path)."""
    gates = (jnp.dot(x_ref[...], w_in_ref[...], preferred_element_type=jnp.float32)
             + jnp.dot(pr_ref[...], w_rd_ref[...], preferred_element_type=jnp.float32)
             + jnp.dot(h_ref[...], w_hh_ref[...], preferred_element_type=jnp.float32)
             + b_ref[...])
    Hp = h_ref.shape[1]
    h_new, c_new = _lstm_update(gates, c_ref[...], Hp)
    h_out_ref[...] = h_new.astype(h_out_ref.dtype)
    c_out_ref[...] = c_new.astype(c_out_ref.dtype)
    y = (jnp.dot(h_new, woh_ref[...], preferred_element_type=jnp.float32)
         + jnp.dot(rd_ref[...], wor_ref[...], preferred_element_type=jnp.float32)
         + bo_ref[...])
    o_out_ref[...] = jax.nn.sigmoid(y).astype(o_out_ref.dtype)


def _seq_kernel(T, Tc, gx_ref, hx_ref, h0_ref, c0_ref, whh_ref, woh_ref,
                h_out_ref, o_out_ref, hT_ref, cT_ref, h_scr, c_scr):
    """Fused controller recurrence, Tc timesteps per grid step.

    gx = precomputed x@W_ih^T + bias,  hx = precomputed read_data@Wo_r^T + b_o.
    Weights are VMEM-resident (constant index maps); h/c live in VMEM scratch.
    Timesteps past T (time padding of the last chunk) are masked so the carried
    state stays exact."""
    chunk = pl.program_id(0)

    @pl.when(chunk == 0)
    def _():
        h_scr[...] = h0_ref[...]
        c_scr[...] = c0_ref[...]

    Hp = h_scr.shape[1]
    base = chunk * Tc

    def body(t, carry):
        h, c = carry
        gates = gx_ref[t] + jnp.dot(h, whh_ref[...], preferred_element_type=jnp.float32)
        h_n, c_n = _lstm_update(gates, c, Hp)
        valid = base + t < T
        h_n = jnp.where(valid, h_n, h)
        c_n = jnp.where(valid, c_n, c)
        h_out_ref[t] = h_n.astype(h_out_ref.dtype)
        y = jnp.dot(h_n, woh_ref[...], preferred_element_type=jnp.float32) + hx_ref[t]
        o_out_ref[t] = jax.nn.sigmoid(y).astype(o_out_ref.dtype)
        return h_n, c_n

    h, c = lax.fori_loop(0, Tc, body, (h_scr[...], c_scr[...]), unroll=True)

    h_scr[...] = h
    c_scr[...] = c
    # Final-state outputs: constant index map -> VMEM-resident, written back once.
    hT_ref[...] = h.astype(hT_ref.dtype)
    cT_ref[...] = c.astype(cT_ref.dtype)


# ---------------------------------------------------------------------------
# pallas_call wrappers
# ---------------------------------------------------------------------------
_VMEM = pl.BlockSpec(memory_space=pltpu.MemorySpace.VMEM)


@jax.jit
def _cell_step(x, reads, h_pad, c_pad, w_in, w_rd, w_hh, bias):
    Bp, Hp = h_pad.shape
    x = _pad_rows(x, Bp)
    reads = _pad_rows(reads, Bp)
    return pl.pallas_call(
        _cell_kernel,
        out_shape=(jax.ShapeDtypeStruct((Bp, Hp), jnp.float32),
                   jax.ShapeDtypeStruct((Bp, Hp), jnp.float32)),
        in_specs=[_VMEM] * 8,
        out_specs=(_VMEM, _VMEM),
    )(x, reads, h_pad, c_pad, w_in, w_rd, w_hh, bias)


@jax.jit
def _head_step(h_pad, reads, wo_h, wo_r, bo):
    Bp = h_pad.shape[0]
    Op = bo.shape[-1]
    reads = _pad_rows(reads, Bp)
    return pl.pallas_call(
        _head_kernel,
        out_shape=jax.ShapeDtypeStruct((Bp, Op), jnp.float32),
        in_specs=[_VMEM] * 5,
        out_specs=_VMEM,
    )(h_pad, reads, wo_h, wo_r, bo)


@jax.jit
def _fused_step(x, prev_reads, read_data, h_pad, c_pad,
                w_in, w_rd, w_hh, bias, wo_h, wo_r, bo):
    Bp, Hp = h_pad.shape
    Op = bo.shape[-1]
    x = _pad_rows(x, Bp)
    prev_reads = _pad_rows(prev_reads, Bp)
    read_data = _pad_rows(read_data, Bp)
    return pl.pallas_call(
        _fused_step_kernel,
        out_shape=(jax.ShapeDtypeStruct((Bp, Hp), jnp.float32),
                   jax.ShapeDtypeStruct((Bp, Hp), jnp.float32),
                   jax.ShapeDtypeStruct((Bp, Op), jnp.float32)),
        in_specs=[_VMEM] * 12,
        out_specs=(_VMEM, _VMEM, _VMEM),
    )(x, prev_reads, read_data, h_pad, c_pad, w_in, w_rd, w_hh, bias, wo_h, wo_r, bo)


@jax.jit
def _run_sequence(in_seq, prev_reads_seq, read_data_seq, h0_pad, c0_pad,
                  w_in, w_rd, bias_pad, w_hh_pad, wo_h_pad, wo_r_pad, out_b_pad):
    T, B, _ = in_seq.shape
    Bp, Hp = h0_pad.shape
    G = 4 * Hp
    Op = out_b_pad.shape[-1]

    # Hoisted non-recurrent projections over ALL timesteps (one big matmul each
    # instead of tiny per-step matmuls inside the recurrent loop).
    gates_x = (jnp.einsum("tbd,dg->tbg", in_seq, w_in)
               + jnp.einsum("tbr,rg->tbg", prev_reads_seq, w_rd)
               + bias_pad)
    head_x = jnp.einsum("tbr,ro->tbo", read_data_seq, wo_r_pad) + out_b_pad

    # Pad batch to a sublane group and time to a multiple of the chunk size.
    Tc = min(_TC, T)
    n_chunks = pl.cdiv(T, Tc)
    Tp = n_chunks * Tc
    gates_x = jnp.pad(gates_x, ((0, Tp - T), (0, Bp - B), (0, 0)))
    head_x = jnp.pad(head_x, ((0, Tp - T), (0, Bp - B), (0, 0)))

    kernel = functools.partial(_seq_kernel, T, Tc)
    t_map = lambda c: (c, 0, 0)
    const2 = lambda c: (0, 0)

    return pl.pallas_call(
        kernel,
        grid=(n_chunks,),
        in_specs=[
            pl.BlockSpec((Tc, Bp, G), t_map),    # gates_x chunk
            pl.BlockSpec((Tc, Bp, Op), t_map),   # head_x chunk
            pl.BlockSpec((Bp, Hp), const2),      # h0 (resident)
            pl.BlockSpec((Bp, Hp), const2),      # c0 (resident)
            pl.BlockSpec((Hp, G), const2),       # W_hh^T (resident)
            pl.BlockSpec((Hp, Op), const2),      # Wo_h^T (resident)
        ],
        out_specs=(
            pl.BlockSpec((Tc, Bp, Hp), t_map),   # per-step h
            pl.BlockSpec((Tc, Bp, Op), t_map),   # per-step output
            pl.BlockSpec((Bp, Hp), const2),      # final h (resident)
            pl.BlockSpec((Bp, Hp), const2),      # final c (resident)
        ),
        out_shape=(
            jax.ShapeDtypeStruct((Tp, Bp, Hp), jnp.float32),
            jax.ShapeDtypeStruct((Tp, Bp, Op), jnp.float32),
            jax.ShapeDtypeStruct((Bp, Hp), jnp.float32),
            jax.ShapeDtypeStruct((Bp, Hp), jnp.float32),
        ),
        scratch_shapes=[pltpu.VMEM((Bp, Hp), jnp.float32),
                        pltpu.VMEM((Bp, Hp), jnp.float32)],
        compiler_params=pltpu.CompilerParams(dimension_semantics=("arbitrary",)),
    )(gates_x, head_x, h0_pad, c0_pad, w_hh_pad, wo_h_pad)


# ---------------------------------------------------------------------------
# NTMController glue (parameter setup, state handling)
# ---------------------------------------------------------------------------
class NTMControllerPallas:
    def __init__(self, input_size, controller_size, output_size, read_data_size,
                 key=jax.random.PRNGKey(0)):
        self.input_size = input_size
        self.controller_size = controller_size
        self.output_size = output_size
        self.read_data_size = read_data_size

        H = controller_size
        self.Hp = _round_up(H, _LANE)
        self.Op = _round_up(output_size, _LANE)

        ks = jax.random.split(key, 8)
        k_lstm = 1.0 / jnp.sqrt(H)
        # nn.LSTMCell(input_size, controller_size): gates ordered [i, f, g, o]
        w_ih = jax.random.uniform(ks[0], (4 * H, input_size), minval=-k_lstm, maxval=k_lstm,
                                  dtype=jnp.float32)
        w_hh = jax.random.uniform(ks[1], (4 * H, H), minval=-k_lstm, maxval=k_lstm,
                                  dtype=jnp.float32)
        b_ih = jax.random.uniform(ks[2], (4 * H,), minval=-k_lstm, maxval=k_lstm,
                                  dtype=jnp.float32)
        b_hh = jax.random.uniform(ks[3], (4 * H,), minval=-k_lstm, maxval=k_lstm,
                                  dtype=jnp.float32)

        # nn.Linear(read_data_size, output_size); kaiming_uniform_(a=sqrt(5)) ~ 1/sqrt(fan_in)
        bound = 1.0 / jnp.sqrt(read_data_size)
        out_w = jax.random.uniform(ks[4], (output_size, read_data_size),
                                   minval=-bound, maxval=bound, dtype=jnp.float32)
        out_b = jax.random.uniform(ks[5], (output_size,), minval=-bound, maxval=bound,
                                   dtype=jnp.float32)

        # h_bias_fc / c_bias_fc = nn.Linear(1, H); reset() feeds 0.0, so only the bias matters.
        self.h_bias = jax.random.uniform(ks[6], (H,), minval=-1.0, maxval=1.0, dtype=jnp.float32)
        self.c_bias = jax.random.uniform(ks[7], (H,), minval=-1.0, maxval=1.0, dtype=jnp.float32)

        # ---- unpadded params (used by the pure-JAX reference check) ----
        self.w_ih_t = w_ih.T                      # (input_size, 4H)
        self.w_hh_t = w_hh.T                      # (H, 4H)
        self.lstm_bias = (b_ih + b_hh)[None, :]   # (1, 4H)
        self.out_w_t = out_w.T                    # (read_data_size, O)
        self.out_b = out_b[None, :]               # (1, O)

        # ---- padded, lane-aligned params used by the kernels ----
        Hp, Op = self.Hp, self.Op
        self.w_ih_pad = _pad_gate_cols(self.w_ih_t, H, Hp)            # (input_size, 4Hp)
        w_hh_cols = _pad_gate_cols(self.w_hh_t, H, Hp)                # (H, 4Hp)
        self.w_hh_pad = jnp.pad(w_hh_cols, ((0, Hp - H), (0, 0)))     # (Hp, 4Hp)
        self.bias_pad = _pad_gate_cols(self.lstm_bias, H, Hp)         # (1, 4Hp)
        self.wo_h_pad = jnp.pad(self.out_w_t[:H], ((0, Hp - H), (0, Op - output_size)))
        self.wo_r_pad = jnp.pad(self.out_w_t[H:], ((0, 0), (0, Op - output_size)))
        self.out_b_pad = jnp.pad(self.out_b, ((0, 0), (0, Op - output_size)))

        # w_ih split cache (split point = in_data width, only known on first use)
        self._w_ih_split = None

        self._batch = 1
        self.Bp = _SUBLANE
        self.h_state_pad = None
        self.c_state_pad = None
        self.reset()

    def _split_w_in(self, din):
        """Cached eager split of w_ih into [in_data rows | read rows] (done once)."""
        if self._w_ih_split is None or self._w_ih_split[0] != din:
            self._w_ih_split = (din, self.w_ih_pad[:din], self.w_ih_pad[din:])
        return self._w_ih_split[1], self._w_ih_split[2]

    # unpadded state views (what the PyTorch module exposes)
    @property
    def h_state(self):
        return self.h_state_pad[:self._batch, :self.controller_size]

    @property
    def c_state(self):
        return self.c_state_pad[:self._batch, :self.controller_size]

    def reset(self, batch_size=1):
        H, Hp = self.controller_size, self.Hp
        self._batch = batch_size
        self.Bp = _round_up(batch_size, _SUBLANE)
        # NOTE: padded gate lanes stay exactly 0 only because padded c starts at 0 here.
        h0 = jnp.pad(self.h_bias, (0, Hp - H))
        c0 = jnp.pad(self.c_bias, (0, Hp - H))
        self.h_state_pad = jnp.tile(h0[None, :], (self.Bp, 1))
        self.c_state_pad = jnp.tile(c0[None, :], (self.Bp, 1))

    def forward(self, in_data, prev_reads):
        reads = _join(prev_reads)
        w_in, w_rd = self._split_w_in(in_data.shape[-1])
        h_pad, c_pad = _cell_step(in_data, reads, self.h_state_pad, self.c_state_pad,
                                  w_in, w_rd, self.w_hh_pad, self.bias_pad)
        self.h_state_pad, self.c_state_pad = h_pad, c_pad
        return self.h_state, self.c_state

    def output(self, read_data):
        reads = _join(read_data)
        o_pad = _head_step(self.h_state_pad, reads,
                           self.wo_h_pad, self.wo_r_pad, self.out_b_pad)
        return o_pad[:self._batch, :self.output_size]

    def step(self, in_data, prev_reads, read_data):
        """Fused forward()+output() in a single pallas_call (the per-token hot path)."""
        w_in, w_rd = self._split_w_in(in_data.shape[-1])
        h_pad, c_pad, o_pad = _fused_step(
            in_data, _join(prev_reads), _join(read_data),
            self.h_state_pad, self.c_state_pad,
            w_in, w_rd, self.w_hh_pad, self.bias_pad,
            self.wo_h_pad, self.wo_r_pad, self.out_b_pad)
        self.h_state_pad, self.c_state_pad = h_pad, c_pad
        B, H, O = self._batch, self.controller_size, self.output_size
        return h_pad[:B, :H], c_pad[:B, :H], o_pad[:B, :O]

    def run_sequence(self, in_seq, prev_reads_seq, read_data_seq):
        """Whole T-step recurrence (forward + output per step) in one pallas_call."""
        T, B, din = in_seq.shape
        w_in, w_rd = self._split_w_in(din)
        h_slab, o_slab, hT, cT = _run_sequence(
            in_seq, prev_reads_seq, read_data_seq,
            self.h_state_pad, self.c_state_pad,
            w_in, w_rd, self.bias_pad, self.w_hh_pad,
            self.wo_h_pad, self.wo_r_pad, self.out_b_pad)
        self.h_state_pad, self.c_state_pad = hT, cT
        H, O = self.controller_size, self.output_size
        return h_slab[:T, :B, :H], o_slab[:T, :B, :O]


# ---------------------------------------------------------------------------
# Pure-JAX reference
# ---------------------------------------------------------------------------
def _ref_cell(x, h, c, w_ih_t, w_hh_t, bias, H):
    gates = x @ w_ih_t + h @ w_hh_t + bias
    i = jax.nn.sigmoid(gates[:, :H])
    f = jax.nn.sigmoid(gates[:, H:2 * H])
    g = jnp.tanh(gates[:, 2 * H:3 * H])
    o = jax.nn.sigmoid(gates[:, 3 * H:])
    c_new = f * c + i * g
    return o * jnp.tanh(c_new), c_new


def _ref_head(h, rd, out_w_t, out_b):
    return jax.nn.sigmoid(jnp.concatenate([h, rd], axis=-1) @ out_w_t + out_b)


if __name__ == "__main__":
    batch = 2
    in_dim = 8
    read_dim = 8
    num_reads = 1
    controller_size = 32
    output_size = 8
    seq_len = 20                                                # not a multiple of _TC
    input_size = in_dim + num_reads * read_dim                  # 16
    read_data_size = controller_size + num_reads * read_dim     # 40

    root = jax.random.PRNGKey(0)
    k_param, k_data = jax.random.split(root)
    ctrl = NTMControllerPallas(input_size, controller_size, output_size,
                               read_data_size, key=k_param)
    ctrl.reset(batch_size=batch)

    k1, k2, k3, k4, k5, k6 = jax.random.split(k_data, 6)
    in_data = jax.random.normal(k1, (batch, in_dim), dtype=jnp.float32)
    prev_reads = [jax.random.normal(k2, (batch, read_dim), dtype=jnp.float32)]
    read_data = [jax.random.normal(k3, (batch, read_dim), dtype=jnp.float32)]

    # --- per-step API (forward + output), exactly like the PyTorch module ---
    h_prev, c_prev = ctrl.h_state, ctrl.c_state
    h, c = ctrl.forward(in_data, prev_reads)
    out = ctrl.output(read_data)
    jax.block_until_ready((h, c, out))

    x = jnp.concatenate([in_data] + prev_reads, axis=-1)
    h_ref, c_ref = _ref_cell(x, h_prev, c_prev, ctrl.w_ih_t, ctrl.w_hh_t,
                             ctrl.lstm_bias, controller_size)
    out_ref = _ref_head(h_ref, read_data[0], ctrl.out_w_t, ctrl.out_b)
    assert h.shape == (batch, controller_size) and c.shape == (batch, controller_size)
    assert out.shape == (batch, output_size)
    assert jnp.allclose(h, h_ref, atol=1e-5), "h mismatch"
    assert jnp.allclose(c, c_ref, atol=1e-5), "c mismatch"
    assert jnp.allclose(out, out_ref, atol=1e-5), "output mismatch"

    # --- fused single step (forward + output in ONE pallas_call) ---
    ctrl.reset(batch_size=batch)
    h1, c1, o1 = ctrl.step(in_data, prev_reads, read_data)
    jax.block_until_ready((h1, c1, o1))
    assert jnp.allclose(h1, h_ref, atol=1e-5), "fused-step h mismatch"
    assert jnp.allclose(c1, c_ref, atol=1e-5), "fused-step c mismatch"
    assert jnp.allclose(o1, out_ref, atol=1e-5), "fused-step output mismatch"

    # --- fused sequence: the whole T-step recurrence, time-chunked grid ---
    ctrl.reset(batch_size=batch)
    in_seq = jax.random.normal(k4, (seq_len, batch, in_dim), dtype=jnp.float32)
    prev_reads_seq = jax.random.normal(k5, (seq_len, batch, num_reads * read_dim),
                                       dtype=jnp.float32)
    read_data_seq = jax.random.normal(k6, (seq_len, batch, num_reads * read_dim),
                                      dtype=jnp.float32)
    h_seq, o_seq = ctrl.run_sequence(in_seq, prev_reads_seq, read_data_seq)
    jax.block_until_ready((h_seq, o_seq))
    assert h_seq.shape == (seq_len, batch, controller_size)
    assert o_seq.shape == (seq_len, batch, output_size)

    h_r = jnp.tile(ctrl.h_bias[None, :], (batch, 1))
    c_r = jnp.tile(ctrl.c_bias[None, :], (batch, 1))
    for t in range(seq_len):
        x_t = jnp.concatenate([in_seq[t], prev_reads_seq[t]], axis=-1)
        h_r, c_r = _ref_cell(x_t, h_r, c_r, ctrl.w_ih_t, ctrl.w_hh_t,
                             ctrl.lstm_bias, controller_size)
        o_r = _ref_head(h_r, read_data_seq[t], ctrl.out_w_t, ctrl.out_b)
        assert jnp.allclose(h_seq[t], h_r, atol=1e-4), f"seq h mismatch at t={t}"
        assert jnp.allclose(o_seq[t], o_r, atol=1e-4), f"seq out mismatch at t={t}"
    assert jnp.allclose(ctrl.h_state, h_r, atol=1e-4), "final h state mismatch"
    assert jnp.allclose(ctrl.c_state, c_r, atol=1e-4), "final c state mismatch"

    print("KERNEL_OK")
</pallas_src>

<mosaic_0001>
module attributes {stable_mosaic.version = 11 : i64} {
  func.func @_cell_kernel(%arg0: memref<8x8xf32, #tpu.memory_space<vmem>>, %arg1: memref<8x8xf32, #tpu.memory_space<vmem>>, %arg2: memref<8x128xf32, #tpu.memory_space<vmem>>, %arg3: memref<8x128xf32, #tpu.memory_space<vmem>>, %arg4: memref<8x512xf32, #tpu.memory_space<vmem>>, %arg5: memref<8x512xf32, #tpu.memory_space<vmem>>, %arg6: memref<128x512xf32, #tpu.memory_space<vmem>>, %arg7: memref<1x512xf32, #tpu.memory_space<vmem>>, %arg8: memref<8x128xf32, #tpu.memory_space<vmem>>, %arg9: memref<8x128xf32, #tpu.memory_space<vmem>>) attributes {dimension_semantics = [], scalar_prefetch = 0 : i64, scratch_operands = 0 : i64, tpu.core_type = #tpu.core_type<tc>} {
    %c0 = arith.constant 0 : index
    %c0_0 = arith.constant 0 : index
    %0 = vector.load %arg0[%c0, %c0_0] : memref<8x8xf32, #tpu.memory_space<vmem>>, vector<8x8xf32>
    %c0_1 = arith.constant 0 : index
    %c0_2 = arith.constant 0 : index
    %1 = vector.load %arg4[%c0_1, %c0_2] : memref<8x512xf32, #tpu.memory_space<vmem>>, vector<8x512xf32>
    %cst = arith.constant dense<0.000000e+00> : vector<8x512xf32>
    %2 = tpu.matmul %0, %1, %cst {dimension_numbers = #tpu.dot_dimension_numbers<[1], [0], [0], [1], [0, 0, 1, 1], [], []>} : vector<8x8xf32>, vector<8x512xf32>, vector<8x512xf32> -> vector<8x512xf32>
    %c0_3 = arith.constant 0 : index
    %c0_4 = arith.constant 0 : index
    %3 = vector.load %arg1[%c0_3, %c0_4] : memref<8x8xf32, #tpu.memory_space<vmem>>, vector<8x8xf32>
    %c0_5 = arith.constant 0 : index
    %c0_6 = arith.constant 0 : index
    %4 = vector.load %arg5[%c0_5, %c0_6] : memref<8x512xf32, #tpu.memory_space<vmem>>, vector<8x512xf32>
    %cst_7 = arith.constant dense<0.000000e+00> : vector<8x512xf32>
    %5 = tpu.matmul %3, %4, %cst_7 {dimension_numbers = #tpu.dot_dimension_numbers<[1], [0], [0], [1], [0, 0, 1, 1], [], []>} : vector<8x8xf32>, vector<8x512xf32>, vector<8x512xf32> -> vector<8x512xf32>
    %6 = arith.addf %2, %5 : vector<8x512xf32>
    %c0_8 = arith.constant 0 : index
    %c0_9 = arith.constant 0 : index
    %7 = vector.load %arg2[%c0_8, %c0_9] : memref<8x128xf32, #tpu.memory_space<vmem>>, vector<8x128xf32>
    %c0_10 = arith.constant 0 : index
    %c0_11 = arith.constant 0 : index
    %8 = vector.load %arg6[%c0_10, %c0_11] : memref<128x512xf32, #tpu.memory_space<vmem>>, vector<128x512xf32>
    %cst_12 = arith.constant dense<0.000000e+00> : vector<8x512xf32>
    %9 = tpu.matmul %7, %8, %cst_12 {dimension_numbers = #tpu.dot_dimension_numbers<[1], [0], [0], [1], [0, 0, 1, 1], [], []>} : vector<8x128xf32>, vector<128x512xf32>, vector<8x512xf32> -> vector<8x512xf32>
    %10 = arith.addf %6, %9 : vector<8x512xf32>
    %c0_13 = arith.constant 0 : index
    %c0_14 = arith.constant 0 : index
    %11 = vector.load %arg7[%c0_13, %c0_14] : memref<1x512xf32, #tpu.memory_space<vmem>>, vector<1x512xf32>
    %12 = vector.broadcast %11 : vector<1x512xf32> to vector<8x512xf32>
    %13 = arith.addf %10, %12 : vector<8x512xf32>
    %c0_15 = arith.constant 0 : index
    %c0_16 = arith.constant 0 : index
    %14 = vector.load %arg3[%c0_15, %c0_16] : memref<8x128xf32, #tpu.memory_space<vmem>>, vector<8x128xf32>
    %15 = vector.extract_strided_slice %13 {offsets = [0, 0], sizes = [8, 128], strides = [1, 1]} : vector<8x512xf32> to vector<8x128xf32>
    %16 = arith.negf %15 : vector<8x128xf32>
    %17 = math.exp %16 : vector<8x128xf32>
    %cst_17 = arith.constant 1.000000e+00 : f32
    %18 = vector.broadcast %cst_17 : f32 to vector<8x128xf32>
    %19 = arith.addf %18, %17 : vector<8x128xf32>
    %20 = arith.divf %18, %19 : vector<8x128xf32>
    %21 = vector.extract_strided_slice %13 {offsets = [0, 128], sizes = [8, 128], strides = [1, 1]} : vector<8x512xf32> to vector<8x128xf32>
    %22 = arith.negf %21 : vector<8x128xf32>
    %23 = math.exp %22 : vector<8x128xf32>
    %cst_18 = arith.constant 1.000000e+00 : f32
    %24 = vector.broadcast %cst_18 : f32 to vector<8x128xf32>
    %25 = arith.addf %24, %23 : vector<8x128xf32>
    %26 = arith.divf %24, %25 : vector<8x128xf32>
    %27 = vector.extract_strided_slice %13 {offsets = [0, 256], sizes = [8, 128], strides = [1, 1]} : vector<8x512xf32> to vector<8x128xf32>
    %28 = math.tanh %27 : vector<8x128xf32>
    %29 = vector.extract_strided_slice %13 {offsets = [0, 384], sizes = [8, 128], strides = [1, 1]} : vector<8x512xf32> to vector<8x128xf32>
    %30 = arith.negf %29 : vector<8x128xf32>
    %31 = math.exp %30 : vector<8x128xf32>
    %cst_19 = arith.constant 1.000000e+00 : f32
    %32 = vector.broadcast %cst_19 : f32 to vector<8x128xf32>
    %33 = arith.addf %32, %31 : vector<8x128xf32>
    %34 = arith.divf %32, %33 : vector<8x128xf32>
    %35 = arith.mulf %26, %14 : vector<8x128xf32>
    %36 = arith.mulf %20, %28 : vector<8x128xf32>
    %37 = arith.addf %35, %36 : vector<8x128xf32>
    %38 = math.tanh %37 : vector<8x128xf32>
    %39 = arith.mulf %34, %38 : vector<8x128xf32>
    %c0_20 = arith.constant 0 : index
    %c0_21 = arith.constant 0 : index
    %40 = vector.load %arg8[%c0_20, %c0_21] : memref<8x128xf32, #tpu.memory_space<vmem>>, vector<8x128xf32>
    tpu.vector_store %arg8[%c0_20, %c0_21], %39 {strides = array<i32>} : memref<8x128xf32, #tpu.memory_space<vmem>>, vector<8x128xf32>,
    %c0_22 = arith.constant 0 : index
    %c0_23 = arith.constant 0 : index
    %41 = vector.load %arg9[%c0_22, %c0_23] : memref<8x128xf32, #tpu.memory_space<vmem>>, vector<8x128xf32>
    tpu.vector_store %arg9[%c0_22, %c0_23], %37 {strides = array<i32>} : memref<8x128xf32, #tpu.memory_space<vmem>>, vector<8x128xf32>,
    return
  }
}

</mosaic_0001>

<bundles_post_ra>
// kernel: _cell_step.1
= control target key start
LH: loop header
LB: loop body
LE: loop exit
PB: predicated region body
PF: predicated region fallthrough
CT: control target
= control target key end

     0   :  { %15 = vsyncpa [#allocation3], 0  ;;  %s1093_s0 = inlined_call_operand.vmem [shape: f32[8,8], index: 0, kind: input, shape index: {}]   ;;  %s1094_s1 = inlined_call_operand.vmem [shape: f32[8,8], index: 1, kind: input, shape index: {}]   ;;  %s1095_s2 = inlined_call_operand.hbm [shape: f32[8,128], index: 2, kind: input, shape index: {}]   ;;  %s1096_s3 = inlined_call_operand.hbm [shape: f32[8,128], index: 3, kind: input, shape index: {}]   ;;  %s1097_s4 = inlined_call_operand.vmem [shape: f32[8,512], index: 4, kind: input, shape index: {}]   ;;  %s1098_s5 = inlined_call_operand.hbm [shape: f32[8,512], index: 5, kind: input, shape index: {}]   ;;  %s1099_s6 = inlined_call_operand.hbm [shape: f32[128,512], index: 6, kind: input, shape index: {}]   ;;  %s1100_s7 = inlined_call_operand.vmem [shape: f32[1,512], index: 7, kind: input, shape index: {}]   ;;  %s1101_s8 = inlined_call_operand.hbm [shape: f32[8,128], index: 8, kind: output, shape index: {0}]   ;;  %s1102_s9 = inlined_call_operand.hbm [shape: f32[8,128], index: 9, kind: output, shape index: {1}]  }
   0x1   :  { %16 = vsyncpa [#allocation6], 0 }
   0x2   :  { %17 = vsyncpa [#allocation9], 0 }
   0x3   :  { %18 = vsyncpa [#allocation4], 0 }
   0x4   :  { %19 = vsyncpa [#allocation12], 0  ;;  %s924_s30 = smov [#allocation5]   ;;  %s925_s11 = smov [#allocation2]  }
   0x5   :  { %s40_s10 = sshll.u32 %s924_s30, 4  ;;  %s30_s12 = sshll.u32 %s925_s11, 4  ;;  %s41_s10 = int_to_ptr.vmem [resolvable:$true] %s40_s10  ;;  %s31_s12 = int_to_ptr.vmem [resolvable:$true] %s30_s12 }
   0x6   :  { %s782_s15 = scalar_lea.hbm %s1096_s3, 128 }
   0x7   :  { %p783_p0 = scmp.ne.s32.totalorder %s1096_s3, %s782_s15  ;;  %p786_p1 = scmp.lt.u32.totalorder %s782_s15, %s1096_s3 }
   0x9   :  { %p788_p2 = pnand %p786_p1, %p783_p0 }
   0xb   :  { %791 = shalt.err (!%p788_p2)
}
   0xc   :  { %s792_s20 = scalar_lea.vmem %s41_s10, 128  ;;  %p797_p4 = scmp.lt.s32.totalorder %s41_s10, %s41_s10 }
   0xd   :  { %p793_p3 = scmp.ne.s32.totalorder %s41_s10, %s792_s20  ;;  %p798_p5 = scmp.lt.s32.totalorder %s792_s20, %s792_s20 }
   0xf   :  { %p799_p6 = por %p798_p5, %p797_p4 }
  0x11   :  { %p800_p7 = pnand %p799_p6, %p793_p3 }
  0x13   :  { %803 = shalt.err (!%p800_p7)
}
  0x14   :  { %43 = dma.hbm_to_vmem [thread:$0]  %s1096_s3, 128, %s41_s10, [#allocation6]  }
  0x15   :  { %s804_s25 = scalar_lea.hbm %s1095_s2, 128 }
  0x16   :  { %p805_p8 = scmp.ne.s32.totalorder %s1095_s2, %s804_s25  ;;  %p808_p9 = scmp.lt.u32.totalorder %s804_s25, %s1095_s2 }
  0x18   :  { %p810_p10 = pnand %p808_p9, %p805_p8 }
  0x1a   :  { %813 = shalt.err (!%p810_p10)
}
  0x1b   :  { %s814_s30 = scalar_lea.vmem %s31_s12, 128  ;;  %p819_p12 = scmp.lt.s32.totalorder %s31_s12, %s31_s12 }
  0x1c   :  { %p815_p11 = scmp.ne.s32.totalorder %s31_s12, %s814_s30  ;;  %p820_p13 = scmp.lt.s32.totalorder %s814_s30, %s814_s30 }
  0x1e   :  { %p821_p0 = por %p820_p13, %p819_p12 }
  0x20   :  { %p822_p1 = pnand %p821_p0, %p815_p11 }
  0x22   :  { %825 = shalt.err (!%p822_p1)
}
  0x23   :  { %33 = dma.hbm_to_vmem [thread:$0]  %s1095_s2, 128, %s31_s12, [#allocation3]  }
  0x24   :  { %s926_s11 = smov [#allocation7]   ;;  %s927_s14 = smov [#allocation8]  }
  0x25   :  { %s52_s13 = sshll.u32 %s926_s11, 4  ;;  %s61_s15 = sshll.u32 %s927_s14, 4  ;;  %s53_s13 = int_to_ptr.vmem [resolvable:$true] %s52_s13  ;;  %s1007_s15 = int_to_ptr.vmem [resolvable:$true] %s61_s15 }
  0x26   :  { %s826_s18 = scalar_lea.hbm %s1098_s5, 512 }
  0x27   :  { %p827_p2 = scmp.ne.s32.totalorder %s1098_s5, %s826_s18  ;;  %p830_p3 = scmp.lt.u32.totalorder %s826_s18, %s1098_s5 }
  0x29   :  { %p832_p4 = pnand %p830_p3, %p827_p2 }
  0x2b   :  { %835 = shalt.err (!%p832_p4)
}
  0x2c   :  { %s836_s2 = scalar_lea.vmem %s53_s13, 512  ;;  %p841_p6 = scmp.lt.s32.totalorder %s53_s13, %s53_s13 }
  0x2d   :  { %p837_p5 = scmp.ne.s32.totalorder %s53_s13, %s836_s2  ;;  %p842_p7 = scmp.lt.s32.totalorder %s836_s2, %s836_s2 }
  0x2f   :  { %p843_p8 = por %p842_p7, %p841_p6 }
  0x31   :  { %p844_p9 = pnand %p843_p8, %p837_p5 }
  0x33   :  { %847 = shalt.err (!%p844_p9)
}
  0x34   :  { %55 = dma.hbm_to_vmem [thread:$0]  %s1098_s5, 512, %s53_s13, [#allocation6]  }
  0x35   :  { %s848_s26 = scalar_lea.hbm %s1099_s6, 8192 }
  0x36   :  { %p849_p10 = scmp.ne.s32.totalorder %s1099_s6, %s848_s26  ;;  %p852_p11 = scmp.lt.u32.totalorder %s848_s26, %s1099_s6 }
  0x38   :  { %p854_p12 = pnand %p852_p11, %p849_p10 }
  0x3a   :  { %857 = shalt.err (!%p854_p12)
}
  0x3b   :  { %s858_s3 = scalar_lea.vmem %s1007_s15, 8192  ;;  %p863_p0 = scmp.lt.s32.totalorder %s1007_s15, %s1007_s15 }
  0x3c   :  { %p859_p13 = scmp.ne.s32.totalorder %s1007_s15, %s858_s3  ;;  %p864_p1 = scmp.lt.s32.totalorder %s858_s3, %s858_s3 }
  0x3e   :  { %p865_p2 = por %p864_p1, %p863_p0 }
  0x40   :  { %p866_p3 = pnand %p865_p2, %p859_p13 }
  0x42   :  { %869 = shalt.err (!%p866_p3)
}
  0x43   :  { %s928_s5 = smov 512   ;;  %s929_s10 = smov 32  }
  0x44   :  { %67 = dma.hbm_to_vmem [thread:$0]  %s1099_s6, 8192, %s1007_s15, [#allocation9], %s928_s5, %s928_s5, %s929_s10  }
  0x45   :  { %914 = dma.done.wait [#allocation3], 128  }
  0x46   :  { %915 = vsyncadd [#allocation3], 4294967168 }
  0x47   :  { %916 = dma.done.wait [#allocation6], 640  }
  0x48   :  { %917 = vsyncadd [#allocation6], 4294966656 }
  0x49   :  { %918 = dma.done.wait [#allocation9], 8192  }
  0x4a   :  { %919 = vsyncadd [#allocation9], 4294959104  ;;  %v930_v0 = vmov 0.0   ;;  %v89_v1 = vld [vmem:[#allocation7 + $0x8] sm:$0xff]  ;;  %v91_v2 = vld [vmem:[#allocation7 + $0x18] sm:$0xff]  ;;  %vm92_vm0 = vcmask 64512  }
  0x4b   :  { %160 = vmatprep.mubr.f32.mxu0 %v930_v0  ;;  %231 = vmatprep.mubr.f32.mxu1 %v930_v0  ;;  %v88_v3 = vld [vmem:[#allocation7] sm:$0xff]  ;;  %v90_v4 = vld [vmem:[#allocation7 + $0x10] sm:$0xff]  ;;  %v84_v6 = vld [vmem:[%s1097_s4 + $0x8] sm:$0xff] }
  0x4c   :  { %96 = vmatprep.subr.mxu0 %v89_v1  ;;  %167 = vmatprep.subr.mxu1 %v91_v2  ;;  %v87_v5 = vld [vmem:[%s1094_s1] sm:$0xff]  ;;  %v86_v8 = vld [vmem:[%s1097_s4 + $0x18] sm:$0xff]  ;;  %v85_v9 = vld [vmem:[%s1097_s4 + $0x10] sm:$0xff] }
  0x4d   :  { %97 = vmatpush1.msra.mxu0 %v88_v3  ;;  %168 = vmatpush1.msra.mxu1 %v90_v4  ;;  %v83_v7 = vld [vmem:[%s1097_s4] sm:$0xff]  ;;  %v385_v10 = vld [vmem:[#allocation8 + $0x8] sm:$0xff]  ;;  %v387_v12 = vld [vmem:[#allocation8 + $0x18] sm:$0xff] }
  0x4e   :  { %678 = vmatmul.mubr.msk.f32.vlgmr.msra.gmra.mrb[0].mxu0 %vm92_vm0, %v87_v5  ;;  %679 = vmatmul.mubr.msk.f32.vlgmr.msra.gmra.mrb[0].mxu1 %vm92_vm0, %v87_v5  ;;  %v389_v11 = vld [vmem:[#allocation8 + $0x28] sm:$0xff]  ;;  %v391_v14 = vld [vmem:[#allocation8 + $0x38] sm:$0xff]  ;;  %v384_v15 = vld [vmem:[#allocation8] sm:$0xff] }
  0x4f   :  { %241 = vmatprep.subr.mxu0 %v84_v6  ;;  %312 = vmatprep.subr.mxu1 %v86_v8  ;;  %v685_v13 = vpack.c.bf16 %v389_v11, %v385_v10  ;;  %v717_v16 = vpack.c.bf16 %v391_v14, %v387_v12  ;;  %v388_v17 = vld [vmem:[#allocation8 + $0x20] sm:$0xff]  ;;  %v386_v18 = vld [vmem:[#allocation8 + $0x10] sm:$0xff]  ;;  %v393_v20 = vld [vmem:[#allocation8 + $0x48] sm:$0xff] }
  0x50   :  { %242 = vmatpush1.msra.mxu0 %v83_v7  ;;  %313 = vmatpush1.msra.mxu1 %v85_v9  ;;  %v390_v19 = vld [vmem:[#allocation8 + $0x30] sm:$0xff]  ;;  %v397_v21 = vld [vmem:[#allocation8 + $0x68] sm:$0xff]  ;;  %v395_v22 = vld [vmem:[#allocation8 + $0x58] sm:$0xff]  ;;  %v687_v25 = vpack.c.bf16 %v388_v17, %v384_v15 }
  0x51   :  { %305 = vmatprep.mubr.f32.mxu0 %v930_v0  ;;  %376 = vmatprep.mubr.f32.mxu1 %v930_v0  ;;  %v399_v23 = vld [vmem:[#allocation8 + $0x78] sm:$0xff]  ;;  %v82_v24 = vld [vmem:[%s1093_s0] sm:$0xff]  ;;  %v719_v26 = vpack.c.bf16 %v390_v19, %v386_v18  ;;  %v392_v27 = vld [vmem:[#allocation8 + $0x40] sm:$0xff]  ;;  %v689_v29 = vpack.c.bf16 %v397_v21, %v393_v20 }
  0x52   :  { %686 = vmatprep.subr.bf16.mxu0 %v685_v13  ;;  %718 = vmatprep.subr.bf16.mxu1 %v717_v16  ;;  %v396_v28 = vld [vmem:[#allocation8 + $0x60] sm:$0xff]  ;;  %v721_v30 = vpack.c.bf16 %v399_v23, %v395_v22  ;;  %v394_v31 = vld [vmem:[#allocation8 + $0x50] sm:$0xff]  ;;  %v401_v33 = vld [vmem:[#allocation8 + $0x88] sm:$0xff] }
  0x53   :  { %v398_v32 = vld [vmem:[#allocation8 + $0x70] sm:$0xff]  ;;  %v405_v34 = vld [vmem:[#allocation8 + $0xa8] sm:$0xff]  ;;  %v403_v35 = vld [vmem:[#allocation8 + $0x98] sm:$0xff]  ;;  %v691_v37 = vpack.c.bf16 %v396_v28, %v392_v27 }
  0x54   :  { %v407_v36 = vld [vmem:[#allocation8 + $0xb8] sm:$0xff]  ;;  %v723_v38 = vpack.c.bf16 %v398_v32, %v394_v31  ;;  %v400_v39 = vld [vmem:[#allocation8 + $0x80] sm:$0xff]  ;;  %v693_v41 = vpack.c.bf16 %v405_v34, %v401_v33  ;;  %v402_v43 = vld [vmem:[#allocation8 + $0x90] sm:$0xff] }
  0x55   :  { %v404_v40 = vld [vmem:[#allocation8 + $0xa0] sm:$0xff]  ;;  %v725_v42 = vpack.c.bf16 %v407_v36, %v403_v35  ;;  %v406_v44 = vld [vmem:[#allocation8 + $0xb0] sm:$0xff]  ;;  %v409_v45 = vld [vmem:[#allocation8 + $0xc8] sm:$0xff] }
  0x56   :  { %680 = vmatmul.mubr.msk.f32.vlgmr.msra.gmra.mrb[0].mxu0 %vm92_vm0, %v82_v24  ;;  %681 = vmatmul.mubr.msk.f32.vlgmr.msra.gmra.mrb[0].mxu1 %vm92_vm0, %v82_v24  ;;  %v413_v46 = vld [vmem:[#allocation8 + $0xe8] sm:$0xff]  ;;  %v411_v47 = vld [vmem:[#allocation8 + $0xd8] sm:$0xff]  ;;  %v695_v49 = vpack.c.bf16 %v404_v40, %v400_v39  ;;  %v727_v50 = vpack.c.bf16 %v406_v44, %v402_v43  ;;  %v408_v51 = vld [vmem:[#allocation8 + $0xc0] sm:$0xff]  ;;  %v596_v44 = vlaneseq }
  0x57   :  { %688 = vmatpush1.bf16.msra.mxu0 %v687_v25  ;;  %720 = vmatpush1.bf16.msra.mxu1 %v719_v26  ;;  %v415_v48 = vld [vmem:[#allocation8 + $0xf8] sm:$0xff]  ;;  %v412_v52 = vld [vmem:[#allocation8 + $0xe0] sm:$0xff]  ;;  %v697_v53 = vpack.c.bf16 %v413_v46, %v409_v45  ;;  %v410_v55 = vld [vmem:[#allocation8 + $0xd0] sm:$0xff] }
  0x58   :  { %690 = vmatprep.subr.bf16.mxu0 %v689_v29  ;;  %722 = vmatprep.subr.bf16.mxu1 %v721_v30  ;;  %v729_v54 = vpack.c.bf16 %v415_v48, %v411_v47  ;;  %v414_v56 = vld [vmem:[#allocation8 + $0xf0] sm:$0xff]  ;;  %v417_v57 = vld [vmem:[#allocation8 + $0x108] sm:$0xff]  ;;  %v419_v59 = vld [vmem:[#allocation8 + $0x118] sm:$0xff]  ;;  %v699_v61 = vpack.c.bf16 %v412_v52, %v408_v51  ;;  %v597_v45 = vshrl.u32 %v596_v44, 7 }
  0x59   :  { %512 = vmatprep.mubr.f32.mxu0 %v930_v0  ;;  %583 = vmatprep.mubr.f32.mxu1 %v930_v0  ;;  %v421_v58 = vld [vmem:[#allocation8 + $0x128] sm:$0xff]  ;;  %v423_v60 = vld [vmem:[#allocation8 + $0x138] sm:$0xff]  ;;  %v731_v62 = vpack.c.bf16 %v414_v56, %v410_v55  ;;  %v416_v63 = vld [vmem:[#allocation8 + $0x100] sm:$0xff] }
  0x5a   :  { %v420_v0 = vld [vmem:[#allocation8 + $0x120] sm:$0xff]  ;;  %v701_v1 = vpack.c.bf16 %v421_v58, %v417_v57  ;;  %v733_v2 = vpack.c.bf16 %v423_v60, %v419_v59  ;;  %v418_v3 = vld [vmem:[#allocation8 + $0x110] sm:$0xff]  ;;  %v425_v5 = vld [vmem:[#allocation8 + $0x148] sm:$0xff]  ;;  %v598_v46 = vsub.s32 0, %v597_v45  ;;  %v602_v48 = vsub.s32 1, %v597_v45 }
  0x5b   :  { %692 = vmatpush1.bf16.msra.mxu0 %v691_v37  ;;  %724 = vmatpush1.bf16.msra.mxu1 %v723_v38  ;;  %v422_v4 = vld [vmem:[#allocation8 + $0x130] sm:$0xff]  ;;  %v429_v6 = vld [vmem:[#allocation8 + $0x168] sm:$0xff]  ;;  %v427_v7 = vld [vmem:[#allocation8 + $0x158] sm:$0xff]  ;;  %v703_v9 = vpack.c.bf16 %v420_v0, %v416_v63 }
  0x5c   :  { %694 = vmatprep.subr.bf16.mxu0 %v693_v41  ;;  %726 = vmatprep.subr.bf16.mxu1 %v725_v42  ;;  %v431_v8 = vld [vmem:[#allocation8 + $0x178] sm:$0xff]  ;;  %v735_v10 = vpack.c.bf16 %v422_v4, %v418_v3  ;;  %v424_v11 = vld [vmem:[#allocation8 + $0x140] sm:$0xff]  ;;  %v705_v13 = vpack.c.bf16 %v429_v6, %v425_v5  ;;  %v426_v15 = vld [vmem:[#allocation8 + $0x150] sm:$0xff] }
  0x5d   :  { %v428_v12 = vld [vmem:[#allocation8 + $0x160] sm:$0xff]  ;;  %v737_v14 = vpack.c.bf16 %v431_v8, %v427_v7  ;;  %v430_v16 = vld [vmem:[#allocation8 + $0x170] sm:$0xff]  ;;  %v433_v17 = vld [vmem:[#allocation8 + $0x188] sm:$0xff] }
  0x5e   :  { %v437_v18 = vld [vmem:[#allocation8 + $0x1a8] sm:$0xff]  ;;  %v435_v19 = vld [vmem:[#allocation8 + $0x198] sm:$0xff]  ;;  %v707_v21 = vpack.c.bf16 %v428_v12, %v424_v11  ;;  %v739_v22 = vpack.c.bf16 %v430_v16, %v426_v15  ;;  %v432_v23 = vld [vmem:[#allocation8 + $0x180] sm:$0xff] }
  0x5f   :  { %696 = vmatpush1.bf16.msra.mxu0 %v695_v49  ;;  %728 = vmatpush1.bf16.msra.mxu1 %v727_v50  ;;  %v439_v20 = vld [vmem:[#allocation8 + $0x1b8] sm:$0xff]  ;;  %v436_v24 = vld [vmem:[#allocation8 + $0x1a0] sm:$0xff]  ;;  %v709_v25 = vpack.c.bf16 %v437_v18, %v433_v17  ;;  %v434_v27 = vld [vmem:[#allocation8 + $0x190] sm:$0xff] }
  0x60   :  { %698 = vmatprep.subr.bf16.mxu0 %v697_v53  ;;  %730 = vmatprep.subr.bf16.mxu1 %v729_v54  ;;  %v741_v26 = vpack.c.bf16 %v439_v20, %v435_v19  ;;  %v438_v28 = vld [vmem:[#allocation8 + $0x1b0] sm:$0xff]  ;;  %v441_v29 = vld [vmem:[#allocation8 + $0x1c8] sm:$0xff]  ;;  %v443_v31 = vld [vmem:[#allocation8 + $0x1d8] sm:$0xff]  ;;  %v711_v33 = vpack.c.bf16 %v436_v24, %v432_v23  ;;  %v610_v53 = vsub.s32 3, %v597_v45 }
  0x61   :  { %v445_v30 = vld [vmem:[#allocation8 + $0x1e8] sm:$0xff]  ;;  %v447_v32 = vld [vmem:[#allocation8 + $0x1f8] sm:$0xff]  ;;  %v743_v34 = vpack.c.bf16 %v438_v28, %v434_v27  ;;  %v440_v35 = vld [vmem:[#allocation8 + $0x1c0] sm:$0xff] }
  0x62   :  { %v713_v36 = vpack.c.bf16 %v445_v30, %v441_v29  ;;  %v745_v37 = vpack.c.bf16 %v447_v32, %v443_v31  ;;  %v444_v38 = vld [vmem:[#allocation8 + $0x1e0] sm:$0xff]  ;;  %v442_v39 = vld [vmem:[#allocation8 + $0x1d0] sm:$0xff]  ;;  %v620_v8 = vld [vmem:[#allocation5] sm:$0xff] }
  0x63   :  { %700 = vmatpush1.bf16.msra.mxu0 %v699_v61  ;;  %732 = vmatpush1.bf16.msra.mxu1 %v731_v62  ;;  %v446_v40 = vld [vmem:[#allocation8 + $0x1f0] sm:$0xff]  ;;  %v715_v41 = vpack.c.bf16 %v444_v38, %v440_v35  ;;  %v606_v61 = vsub.s32 2, %v597_v45 }
  0x64   :  { %702 = vmatprep.subr.bf16.mxu0 %v701_v1  ;;  %734 = vmatprep.subr.bf16.mxu1 %v733_v2  ;;  %v747_v42 = vpack.c.bf16 %v446_v40, %v442_v39  ;;  %v383_v43 = vld [vmem:[#allocation2] sm:$0xff] }
  0x65   :  { %v594_v47 = vld [vmem:[%s1100_s7] sm:$0xf]  ;;  %s931_s7 = smov [#allocation11]  }
  0x66   :  { %v599_v49 = vrot.slane %v594_v47, %v598_v46  ;;  %v603_v50 = vrot.slane %v594_v47, %v602_v48  ;;  %v611_v60 = vrot.slane %v594_v47, %v610_v53  ;;  %v607_v63 = vrot.slane %v594_v47, %v606_v61  ;;  %s663_s12 = sshll.u32 %s931_s7, 4  ;;  %s664_s12 = int_to_ptr.vmem [resolvable:$true] %s663_s12 }
  0x67   :  { %704 = vmatpush1.bf16.msra.mxu0 %v703_v9  ;;  %736 = vmatpush1.bf16.msra.mxu1 %v735_v10  ;;  %s870_s23 = scalar_lea.vmem %s664_s12, 128  ;;  %p875_p5 = scmp.lt.s32.totalorder %s664_s12, %s664_s12 }
  0x68   :  { %706 = vmatprep.subr.bf16.mxu0 %v705_v13  ;;  %738 = vmatprep.subr.bf16.mxu1 %v737_v14  ;;  %p871_p4 = scmp.ne.s32.totalorder %s664_s12, %s870_s23  ;;  %p876_p6 = scmp.lt.s32.totalorder %s870_s23, %s870_s23 }
  0x6a   :  { %p877_p7 = por %p876_p6, %p875_p5 }
  0x6b   :  { %708 = vmatpush1.bf16.msra.mxu0 %v707_v21  ;;  %740 = vmatpush1.bf16.msra.mxu1 %v739_v22 }
  0x6c   :  { %710 = vmatprep.subr.bf16.mxu0 %v709_v25  ;;  %742 = vmatprep.subr.bf16.mxu1 %v741_v26  ;;  %p878_p8 = pnand %p877_p7, %p871_p4 }
  0x6f   :  { %712 = vmatpush1.bf16.msra.mxu0 %v711_v33  ;;  %744 = vmatpush1.bf16.msra.mxu1 %v743_v34 }
  0x70   :  { %714 = vmatprep.subr.bf16.mxu0 %v713_v36  ;;  %746 = vmatprep.subr.bf16.mxu1 %v745_v37 }
  0x73   :  { %716 = vmatpush1.bf16.msra.mxu0 %v715_v41  ;;  %748 = vmatpush1.bf16.msra.mxu1 %v747_v42 }
  0x76   :  { %513 = vmatmul.mubr.f32.vlgmr.msra.gmra.mrb[0].mxu0 %v383_v43  ;;  %584 = vmatmul.mubr.f32.vlgmr.msra.gmra.mrb[0].mxu1 %v383_v43 }
 0x149   :  { %v514_v51 = vpop.f32.mrb[0].mxu0  ;;  %v585_v52 = vpop.f32.mrb[0].mxu1 }
 0x14a   :  { %v616_v54 = vadd.f32 %v599_v49, %v514_v51  ;;  %v516_v55 = vpop.f32.mrb[1].mxu0  ;;  %v587_v56 = vpop.f32.mrb[1].mxu1  ;;  %v618_v1 = vadd.f32 %v607_v63, %v585_v52 }
 0x14b   :  { %v617_v57 = vadd.f32 %v603_v50, %v516_v55  ;;  %v619_v62 = vadd.f32 %v611_v60, %v587_v56 }
 0x14c   :  { %v682_v58 = vmul.f32 -1.442695, %v616_v54 }
 0x14d   :  { %v683_v59 = vmul.f32 -1.442695, %v617_v57  ;;  %v684_v0 = vmul.f32 -1.442695, %v619_v62 }
 0x14e   :  { %766 = vpow2.f32 %v682_v58 }
 0x14f   :  { %768 = vpow2.f32 %v683_v59 }
 0x150   :  { %770 = vpow2.f32 %v684_v0 }
 0x151   :  { %772 = vtanh.f32 %v618_v1 }
 0x158   :  { %v767_v2 = vpop.eup %766 }
 0x159   :  { %v769_v3 = vpop.eup %768  ;;  %v624_v4 = vadd.f32 1.0, %v767_v2 }
 0x15a   :  { %v630_v5 = vadd.f32 1.0, %v769_v3  ;;  %v771_v6 = vpop.eup %770 }
 0x15b   :  { %774 = vrcp.f32 %v624_v4  ;;  %v773_v7 = vpop.eup %772  ;;  %v637_v12 = vadd.f32 1.0, %v771_v6 }
 0x15c   :  { %776 = vrcp.f32 %v630_v5 }
 0x15d   :  { %778 = vrcp.f32 %v637_v12 }
 0x165   :  { %v775_v9 = vpop.eup %774 }
 0x166   :  { %v777_v10 = vpop.eup %776  ;;  %v641_v11 = vmul.f32 %v775_v9, %v773_v7 }
 0x167   :  { %v640_v13 = vmul.f32 %v777_v10, %v620_v8 }
 0x169   :  { %v642_v14 = vadd.f32 %v641_v11, %v640_v13 }
 0x16b   :  { %780 = vtanh.f32 %v642_v14  ;;  %646 = vst [vmem:[#allocation11] sm:$0xff] %v642_v14 }
 0x16c   :  { %881 = shalt.err (!%p878_p8)
}
 0x16d   :  { %s882_s26 = scalar_lea.hbm %s1102_s9, 128 }
 0x16e   :  { %p883_p9 = scmp.ne.s32.totalorder %s1102_s9, %s882_s26  ;;  %p886_p10 = scmp.lt.u32.totalorder %s882_s26, %s1102_s9 }
 0x170   :  { %p888_p11 = pnand %p886_p10, %p883_p9 }
 0x172   :  { %891 = shalt.err (!%p888_p11)
}
 0x173   :  { %666 = dma.vmem_to_hbm [thread:$0]  %s664_s12, 128, %s1102_s9, [#allocation12]   ;;  %v779_v15 = vpop.eup %778 }
 0x174   :  { %s932_s10 = smov [#allocation10]  }
 0x175   :  { %s653_s11 = sshll.u32 %s932_s10, 4  ;;  %v781_v16 = vpop.eup %780  ;;  %s654_s11 = int_to_ptr.vmem [resolvable:$true] %s653_s11 }
 0x176   :  { %v644_v17 = vmul.f32 %v781_v16, %v779_v15  ;;  %s892_s13 = scalar_lea.vmem %s654_s11, 128  ;;  %p897_p13 = scmp.lt.s32.totalorder %s654_s11, %s654_s11 }
 0x177   :  { %p893_p12 = scmp.ne.s32.totalorder %s654_s11, %s892_s13  ;;  %p898_p0 = scmp.lt.s32.totalorder %s892_s13, %s892_s13 }
 0x178   :  { %645 = vst [vmem:[#allocation10] sm:$0xff] %v644_v17 }
 0x179   :  { %p899_p1 = por %p898_p0, %p897_p13 }
 0x17b   :  { %p900_p2 = pnand %p899_p1, %p893_p12 }
 0x17d   :  { %903 = shalt.err (!%p900_p2)
}
 0x17e   :  { %s904_s15 = scalar_lea.hbm %s1101_s8, 128 }
 0x17f   :  { %p905_p3 = scmp.ne.s32.totalorder %s1101_s8, %s904_s15  ;;  %p908_p4 = scmp.lt.u32.totalorder %s904_s15, %s1101_s8 }
 0x181   :  { %p910_p5 = pnand %p908_p4, %p905_p3 }
 0x183   :  { %913 = shalt.err (!%p910_p5)
}
 0x184   :  { %656 = dma.vmem_to_hbm [thread:$0]  %s654_s11, 128, %s1101_s8, [#allocation4]  }
 0x185   :  { %920 = dma.done.wait [#allocation4], 128  }
 0x186   :  { %921 = vsyncadd [#allocation4], 4294967168 }
 0x187   :  { %922 = dma.done.wait [#allocation12], 128  }
 0x188   :  { %923 = vsyncadd [#allocation12], 4294967168 }
 0x189   :  { %673 = vsyncpa [#allocation3], 1 }
 0x18a   :  { %674 = vsyncpa [#allocation6], 1 }
 0x18b   :  { %675 = vsyncpa [#allocation9], 1 }
 0x18c   :  { %676 = vsyncpa [#allocation4], 1 }
 0x18d   :  { %677 = vsyncpa [#allocation12], 1 }

</bundles_post_ra>
